<compile_context>
chip_gen: v6e
topology: v6e:2x2x1
jax: 0.10.0
libtpu: 0.0.40
codegen_flags: <defaults>
</compile_context>

<pallas_src>
import jax
import jax.numpy as jnp
from jax.experimental import pallas as pl
from jax.experimental.pallas import tpu as pltpu

# ---- module hyper-parameters (consistent with TextCNN.__init__) --------------
VOCAB_SIZE = 50
EMBED_DIM = 32       # embedding_dim
NUM_FILTERS = 16     # num_filters
KERNEL_SIZE = 3      # kernel_size
MAX_LENGTH = 16      # max_length (token sequence length)
BATCH = 2
L_OUT = MAX_LENGTH - KERNEL_SIZE + 1     # Conv1d 'valid' length == pool window
ROWS = BATCH * MAX_LENGTH                # fused (batch * position) rows = 32


def textcnn_kernel(tok_ref, embt_ref, cw_ref, cb_ref, fw_ref, fb_ref, out_ref):
    """Fused TextCNN forward.

    tok_ref  : (B*L, 1)   int32  token ids (batch-major, flattened)
    embt_ref : (V, E)     f32    embedding table
    cw_ref   : (K, E, F)  f32    conv weight, tap-major stack
    cb_ref   : (1, F)     f32    conv bias
    fw_ref   : (1, F)     f32    fc weight (PyTorch Linear layout, out_features=1)
    fb_ref   : (1, 1)     f32    fc bias
    out_ref  : (B, 1)     f32
    """
    # --- embedding gather as a one-hot MXU matmul (no XLA gather on the host path)
    tok = tok_ref[...]                                                     # (B*L, 1)
    vocab_ids = jax.lax.broadcasted_iota(jnp.int32, (ROWS, VOCAB_SIZE), 1)
    one_hot = (tok == vocab_ids).astype(jnp.float32)                       # (B*L, V)
    emb = jnp.dot(one_hot, embt_ref[...],
                  preferred_element_type=jnp.float32)                      # (B*L, E)

    # --- conv as K accumulated matmuls over rolled taps (no scratch, no concat).
    #     tap_dk[r, :] = emb[(r + dk) % ROWS, :]; rows whose tap window runs past
    #     their own sequence (l >= L_OUT) pick up wrapped / cross-batch rows and
    #     are masked to -inf before the max-pool below.
    conv = jnp.dot(emb, cw_ref[0], preferred_element_type=jnp.float32)     # (B*L, F)
    for dk in range(1, KERNEL_SIZE):
        tap = pltpu.roll(emb, shift=ROWS - dk, axis=0)                     # == shift -dk
        conv = conv + jnp.dot(tap, cw_ref[dk], preferred_element_type=jnp.float32)

    # --- masked max-pool over the valid conv length, on the flat (B*L, F) tensor;
    #     conv bias applied after the max (constant along the pooled axis).
    pos = jax.lax.broadcasted_iota(jnp.int32, (ROWS, NUM_FILTERS), 0)
    pos_in_seq = jnp.bitwise_and(pos, MAX_LENGTH - 1)   # row % MAX_LENGTH (power of 2)
    masked = jnp.where(pos_in_seq < L_OUT, conv, -jnp.inf)
    m0 = jnp.max(masked[0:MAX_LENGTH, :], axis=0, keepdims=True)           # batch 0
    m1 = jnp.max(masked[MAX_LENGTH:ROWS, :], axis=0, keepdims=True)        # batch 1
    pooled = jnp.concatenate([m0, m1], axis=0) + cb_ref[...]               # (B, F)

    # --- out_features=1 Linear as a VPU multiply + lane reduce (no N=1 MXU matmul)
    out = jnp.sum(pooled * fw_ref[...], axis=1, keepdims=True) + fb_ref[...]
    out_ref[...] = out.astype(out_ref.dtype)

    # TODO(synk): for a real serving/eval loop, batch many sequences per call and
    # add a grid over (batch*position) row tiles with
    # dimension_semantics=("parallel",) (2 TCs on v7x), switch the gather from
    # one-hot matmul to a per-tile DMA gather, cast MXU operands to bf16 (f32
    # accumulation) on v6e/v7x, keep the output slab lane-dense, and re-derive
    # tile sizes for v7x's 64 MiB (32 MiB scoped) VMEM.


def prepare_params(emb_table, conv_w, conv_b, fc_w, fc_b):
    """One-time parameter re-layout (PyTorch layouts -> kernel layouts).

    Done at parameter-load time, NOT inside the jitted per-call path.
    """
    # Conv1d weight (F, E, K) -> tap-major stack (K, E, F).
    cw = jnp.transpose(conv_w, (2, 1, 0))
    cb = conv_b.reshape(1, NUM_FILTERS)
    fw = fc_w.reshape(1, NUM_FILTERS)           # nn.Linear(F, 1).weight is already (1, F)
    fb = fc_b.reshape(1, 1)
    return (emb_table.astype(jnp.float32), cw.astype(jnp.float32),
            cb.astype(jnp.float32), fw.astype(jnp.float32), fb.astype(jnp.float32))


def prepare_tokens(tokens):
    """Calling-convention prep (flatten + cast) at data-prep time, off the jitted path.

    NOTE: out-of-range / negative token ids produce an all-zero embedding row via
    the in-kernel one-hot matmul (PyTorch nn.Embedding would error) -- validate on
    the host if that matters.
    """
    return jnp.asarray(tokens, jnp.int32).reshape(ROWS, 1)


@jax.jit
def textcnn_forward(tok, emb_table, cw, cb, fw, fb):
    vmem = pl.BlockSpec(memory_space=pltpu.MemorySpace.VMEM)
    return pl.pallas_call(
        textcnn_kernel,
        out_shape=jax.ShapeDtypeStruct((BATCH, 1), jnp.float32),
        in_specs=[vmem] * 6,
        out_specs=vmem,
        compiler_params=pltpu.CompilerParams(vmem_limit_bytes=4 * 1024 * 1024),
    )(tok, emb_table, cw, cb, fw, fb)


def reference_forward(tokens, emb_table, conv_w, conv_b, fc_w, fc_b):
    """Pure-JAX reference mirroring the PyTorch forward (NCW conv)."""
    emb = jnp.take(emb_table, tokens, axis=0)          # (B, L, E)
    x = jnp.transpose(emb, (0, 2, 1))                  # permute -> (B, E, L)
    y = jax.lax.conv_general_dilated(
        x, conv_w, window_strides=(1,), padding='VALID',
        dimension_numbers=('NCH', 'OIH', 'NCH'))       # (B, F, Lout)
    y = y + conv_b[None, :, None]
    pooled = jnp.max(y, axis=2)                        # MaxPool1d + squeeze(2)
    return pooled @ fc_w.T + fc_b[None, :]             # (B, 1)


if __name__ == "__main__":
    key = jax.random.PRNGKey(0)
    k1, k2, k3, k4, k5, k6 = jax.random.split(key, 6)

    # Deterministic synthetic parameters (shapes match nn.Embedding/Conv1d/Linear).
    tokens = jax.random.randint(k1, (BATCH, MAX_LENGTH), 0, VOCAB_SIZE, dtype=jnp.int32)
    emb_table = jax.random.normal(k2, (VOCAB_SIZE, EMBED_DIM), jnp.float32)
    conv_w = 0.1 * jax.random.normal(k3, (NUM_FILTERS, EMBED_DIM, KERNEL_SIZE), jnp.float32)
    conv_b = 0.1 * jax.random.normal(k4, (NUM_FILTERS,), jnp.float32)
    fc_w = 0.1 * jax.random.normal(k5, (1, NUM_FILTERS), jnp.float32)
    fc_b = 0.1 * jax.random.normal(k6, (1,), jnp.float32)

    # One-time re-layouts at data/parameter-load time (outside the jitted path).
    params = prepare_params(emb_table, conv_w, conv_b, fc_w, fc_b)
    tok = prepare_tokens(tokens)

    out = textcnn_forward(tok, *params)
    out = jax.block_until_ready(out)
    assert out.shape == (BATCH, 1), out.shape

    ref = reference_forward(tokens, emb_table, conv_w, conv_b, fc_w, fc_b)
    assert jnp.allclose(out, ref, atol=1e-4, rtol=1e-4), (out, ref)

    print("KERNEL_OK")
</pallas_src>

<mosaic_0001>
module attributes {stable_mosaic.version = 11 : i64} {
  func.func @textcnn_kernel(%arg0: memref<32x1xi32, #tpu.memory_space<vmem>>, %arg1: memref<50x32xf32, #tpu.memory_space<vmem>>, %arg2: memref<3x32x16xf32, #tpu.memory_space<vmem>>, %arg3: memref<1x16xf32, #tpu.memory_space<vmem>>, %arg4: memref<1x16xf32, #tpu.memory_space<vmem>>, %arg5: memref<1x1xf32, #tpu.memory_space<vmem>>, %arg6: memref<2x1xf32, #tpu.memory_space<vmem>>) attributes {dimension_semantics = [], scalar_prefetch = 0 : i64, scratch_operands = 0 : i64, tpu.core_type = #tpu.core_type<tc>} {
    %c0 = arith.constant 0 : index
    %c0_0 = arith.constant 0 : index
    %0 = vector.load %arg0[%c0, %c0_0] : memref<32x1xi32, #tpu.memory_space<vmem>>, vector<32x1xi32>
    %1 = tpu.iota {dimensions = array<i32: 1>} : vector<32x50xi32>
    %2 = vector.broadcast %0 : vector<32x1xi32> to vector<32x50xi32>
    %3 = arith.cmpi eq, %2, %1 : vector<32x50xi32>
    %4 = arith.extui %3 : vector<32x50xi1> to vector<32x50xi32>
    %5 = arith.sitofp %4 : vector<32x50xi32> to vector<32x50xf32>
    %c0_1 = arith.constant 0 : index
    %c0_2 = arith.constant 0 : index
    %6 = vector.load %arg1[%c0_1, %c0_2] : memref<50x32xf32, #tpu.memory_space<vmem>>, vector<50x32xf32>
    %cst = arith.constant dense<0.000000e+00> : vector<32x32xf32>
    %7 = tpu.matmul %5, %6, %cst {dimension_numbers = #tpu.dot_dimension_numbers<[1], [0], [0], [1], [0, 0, 1, 1], [], []>} : vector<32x50xf32>, vector<50x32xf32>, vector<32x32xf32> -> vector<32x32xf32>
    %c0_3 = arith.constant 0 : index
    %c0_4 = arith.constant 0 : index
    %c0_5 = arith.constant 0 : index
    %8 = vector.load %arg2[%c0_3, %c0_4, %c0_5] : memref<3x32x16xf32, #tpu.memory_space<vmem>>, vector<1x32x16xf32>
    %9 = vector.shape_cast %8 : vector<1x32x16xf32> to vector<32x16xf32>
    %cst_6 = arith.constant dense<0.000000e+00> : vector<32x16xf32>
    %10 = tpu.matmul %7, %9, %cst_6 {dimension_numbers = #tpu.dot_dimension_numbers<[1], [0], [0], [1], [0, 0, 1, 1], [], []>} : vector<32x32xf32>, vector<32x16xf32>, vector<32x16xf32> -> vector<32x16xf32>
    %c31_i32 = arith.constant 31 : i32
    %11 = tpu.dynamic_rotate %7 by %c31_i32 dim 0 : vector<32x32xf32>, i32 -> vector<32x32xf32>
    %c1 = arith.constant 1 : index
    %c0_7 = arith.constant 0 : index
    %c0_8 = arith.constant 0 : index
    %12 = vector.load %arg2[%c1, %c0_7, %c0_8] : memref<3x32x16xf32, #tpu.memory_space<vmem>>, vector<1x32x16xf32>
    %13 = vector.shape_cast %12 : vector<1x32x16xf32> to vector<32x16xf32>
    %cst_9 = arith.constant dense<0.000000e+00> : vector<32x16xf32>
    %14 = tpu.matmul %11, %13, %cst_9 {dimension_numbers = #tpu.dot_dimension_numbers<[1], [0], [0], [1], [0, 0, 1, 1], [], []>} : vector<32x32xf32>, vector<32x16xf32>, vector<32x16xf32> -> vector<32x16xf32>
    %15 = arith.addf %10, %14 : vector<32x16xf32>
    %c30_i32 = arith.constant 30 : i32
    %16 = tpu.dynamic_rotate %7 by %c30_i32 dim 0 : vector<32x32xf32>, i32 -> vector<32x32xf32>
    %c2 = arith.constant 2 : index
    %c0_10 = arith.constant 0 : index
    %c0_11 = arith.constant 0 : index
    %17 = vector.load %arg2[%c2, %c0_10, %c0_11] : memref<3x32x16xf32, #tpu.memory_space<vmem>>, vector<1x32x16xf32>
    %18 = vector.shape_cast %17 : vector<1x32x16xf32> to vector<32x16xf32>
    %cst_12 = arith.constant dense<0.000000e+00> : vector<32x16xf32>
    %19 = tpu.matmul %16, %18, %cst_12 {dimension_numbers = #tpu.dot_dimension_numbers<[1], [0], [0], [1], [0, 0, 1, 1], [], []>} : vector<32x32xf32>, vector<32x16xf32>, vector<32x16xf32> -> vector<32x16xf32>
    %20 = arith.addf %15, %19 : vector<32x16xf32>
    %21 = tpu.iota {dimensions = array<i32: 0>} : vector<32x16xi32>
    %c15_i32 = arith.constant 15 : i32
    %22 = vector.broadcast %c15_i32 : i32 to vector<32x16xi32>
    %23 = arith.andi %21, %22 : vector<32x16xi32>
    %c14_i32 = arith.constant 14 : i32
    %24 = vector.broadcast %c14_i32 : i32 to vector<32x16xi32>
    %25 = arith.cmpi slt, %23, %24 : vector<32x16xi32>
    %cst_13 = arith.constant 0xFF800000 : f32
    %26 = vector.broadcast %cst_13 : f32 to vector<32x16xf32>
    %27 = arith.select %25, %20, %26 : vector<32x16xi1>, vector<32x16xf32>
    %28 = vector.extract_strided_slice %27 {offsets = [0, 0], sizes = [16, 16], strides = [1, 1]} : vector<32x16xf32> to vector<16x16xf32>
    %cst_14 = arith.constant dense<0xFF800000> : vector<16xf32>
    %29 = vector.multi_reduction <maximumf>, %28, %cst_14 [0] : vector<16x16xf32> to vector<16xf32>
    %30 = vector.shape_cast %29 : vector<16xf32> to vector<1x16xf32>
    %31 = vector.extract_strided_slice %27 {offsets = [16, 0], sizes = [16, 16], strides = [1, 1]} : vector<32x16xf32> to vector<16x16xf32>
    %cst_15 = arith.constant dense<0xFF800000> : vector<16xf32>
    %32 = vector.multi_reduction <maximumf>, %31, %cst_15 [0] : vector<16x16xf32> to vector<16xf32>
    %33 = vector.shape_cast %32 : vector<16xf32> to vector<1x16xf32>
    %34 = tpu.concatenate %30, %33 in 0 : vector<1x16xf32>, vector<1x16xf32> -> vector<2x16xf32>
    %c0_16 = arith.constant 0 : index
    %c0_17 = arith.constant 0 : index
    %35 = vector.load %arg3[%c0_16, %c0_17] : memref<1x16xf32, #tpu.memory_space<vmem>>, vector<1x16xf32>
    %36 = vector.broadcast %35 : vector<1x16xf32> to vector<2x16xf32>
    %37 = arith.addf %34, %36 : vector<2x16xf32>
    %c0_18 = arith.constant 0 : index
    %c0_19 = arith.constant 0 : index
    %38 = vector.load %arg4[%c0_18, %c0_19] : memref<1x16xf32, #tpu.memory_space<vmem>>, vector<1x16xf32>
    %39 = vector.broadcast %38 : vector<1x16xf32> to vector<2x16xf32>
    %40 = arith.mulf %37, %39 : vector<2x16xf32>
    %cst_20 = arith.constant dense<0.000000e+00> : vector<2xf32>
    %41 = vector.multi_reduction <add>, %40, %cst_20 [1] : vector<2x16xf32> to vector<2xf32>
    %42 = vector.shape_cast %41 : vector<2xf32> to vector<2x1xf32>
    %c0_21 = arith.constant 0 : index
    %c0_22 = arith.constant 0 : index
    %43 = vector.load %arg5[%c0_21, %c0_22] : memref<1x1xf32, #tpu.memory_space<vmem>>, vector<1x1xf32>
    %44 = vector.broadcast %43 : vector<1x1xf32> to vector<2x1xf32>
    %45 = arith.addf %42, %44 : vector<2x1xf32>
    %c0_23 = arith.constant 0 : index
    %c0_24 = arith.constant 0 : index
    %46 = vector.load %arg6[%c0_23, %c0_24] : memref<2x1xf32, #tpu.memory_space<vmem>>, vector<2x1xf32>
    tpu.vector_store %arg6[%c0_23, %c0_24], %45 {strides = array<i32>} : memref<2x1xf32, #tpu.memory_space<vmem>>, vector<2x1xf32>,
    return
  }
}

</mosaic_0001>

<bundles_post_ra>
// kernel: textcnn_forward.1
= control target key start
LH: loop header
LB: loop body
LE: loop exit
PB: predicated region body
PF: predicated region fallthrough
CT: control target
= control target key end

     0   :  { %vm75_vm0 = vcmask 1041408   ;;  %v705_v0 = vmov 0   ;;  %v29_v12 = vlaneseq  ;;  %vm62_vm1 = vcmask 408576   ;;  %s867_s0 = inlined_call_operand.vmem [shape: s32[32,1], index: 0, kind: input, shape index: {}]   ;;  %s868_s1 = inlined_call_operand.vmem [shape: f32[50,32], index: 1, kind: input, shape index: {}]   ;;  %s869_s2 = inlined_call_operand.vmem [shape: f32[3,32,16], index: 2, kind: input, shape index: {}]   ;;  %s870_s5 = inlined_call_operand.<no memory space> [shape: f32[1,1], index: 5, kind: input, shape index: {}]   ;;  %s871_s3 = inlined_call_operand.vmem [shape: f32[1,16], index: 3, kind: input, shape index: {}]   ;;  %s872_s4 = inlined_call_operand.vmem [shape: f32[1,16], index: 4, kind: input, shape index: {}]   ;;  %s873_s6 = inlined_call_operand.vmem [shape: f32[2,1], index: 6, kind: output, shape index: {}]  }
   0x1   :  { %704 = vset.pattern.permute.xlu1 %v705_v0  ;;  %703 = vset.pattern.permute.xlu0 %v705_v0  ;;  %v27_v1 = vld [vmem:[%s867_s0 + $0x10] sm:$0xff]  ;;  %v25_v2 = vld [vmem:[%s867_s0] sm:$0xff]  ;;  %v60_v4 = vld [vmem:[%s868_s1 + $0x28] sm:$0xff]  ;;  %v706_v16 = vmov 0.0   ;;  %vm184_vm7 = vcmask 261120   ;;  %v11_v56 = vstv %s870_s5  ;;  %vm509_vm10 = vcmask 130048  }
   0x2   :  { %38 = vperm.xlu1 %704, %v27_v1   ;;  %32 = vperm.xlu0 %703, %v25_v2   ;;  %v61_v3 = vld [vmem:[%s868_s1 + $0x30] sm:$0x3]  ;;  %v28_v5 = vld [vmem:[%s867_s0 + $0x18] sm:$0xff]  ;;  %v26_v6 = vld [vmem:[%s867_s0 + $0x8] sm:$0xff]  ;;  %v30_v13 = vand.u32 127, %v29_v12  ;;  %v806_v32 = vshrl.u32 %v29_v12, 7 }
   0x3   :  { %631 = vmatprep.subr.msk.mxu0 %vm75_vm0, %v61_v3  ;;  %v59_v7 = vld [vmem:[%s868_s1 + $0x20] sm:$0xff]  ;;  %v58_v8 = vld [vmem:[%s868_s1 + $0x18] sm:$0xff]  ;;  %v57_v9 = vld [vmem:[%s868_s1 + $0x10] sm:$0xff]  ;;  %12 = vst [vmem:[#allocation2] sm:$0x1] %v11_v56  ;;  %vm528_vm12 = vcmask 1040384  }
   0x4   :  { %632 = vmatpush3.msk.msra.mxu0 %vm75_vm0, %v61_v3  ;;  %v56_v10 = vld [vmem:[%s868_s1 + $0x8] sm:$0xff]  ;;  %v55_v11 = vld [vmem:[%s868_s1] sm:$0xff]  ;;  %v576_v23 = vld [vmem:[%s869_s2 + $0x38] sm:$0xff]  ;;  %vm174_vm6 = vcmp.lt.s32.totalorder %v806_v32, 7  ;;  %vm383_vm8 = vcmp.lt.s32.totalorder %v806_v32, 6  ;;  %v494_v59 = vadd.s32 8, %v806_v32 }
   0x5   :  { %633 = vmatprep.subr.mxu0 %v60_v4  ;;  %v781_v24 = vld [vmem:[%s869_s2 + $0x58] sm:$0xff]  ;;  %651 = vmatprep.subr.mxu1 %v576_v23  ;;  %v575_v25 = vld [vmem:[%s869_s2 + $0x30] sm:$0xff]  ;;  %v574_v27 = vld [vmem:[%s869_s2 + $0x28] sm:$0xff]  ;;  %v496_v1 = vadd.s32 24, %v806_v32  ;;  %vm546_vm13 = vcmask 123904   ;;  %vm558_vm14 = vcmask 1024  }
   0x6   :  { %41 = vperm.xlu1 %704, %v28_v5   ;;  %35 = vperm.xlu0 %703, %v26_v6   ;;  %v587_v26 = vld [vmem:[%s869_s2 + $0x50] sm:$0xff]  ;;  %v586_v28 = vld [vmem:[%s869_s2 + $0x48] sm:$0xff]  ;;  %v573_v29 = vld [vmem:[%s869_s2 + $0x20] sm:$0xff]  ;;  %v498_v62 = vand.u32 15, %v494_v59 }
   0x7   :  { %634 = vmatpush3.msra.mxu0 %v60_v4  ;;  %652 = vmatpush3.msra.mxu1 %v576_v23  ;;  %v585_v30 = vld [vmem:[%s869_s2 + $0x40] sm:$0xff]  ;;  %v167_v31 = vld [vmem:[%s869_s2 + $0x18] sm:$0xff]  ;;  %v166_v49 = vld [vmem:[%s869_s2 + $0x10] sm:$0xff] }
   0x8   :  { %635 = vmatprep.subr.mxu0 %v59_v7  ;;  %653 = vmatprep.subr.mxu1 %v575_v25  ;;  %v165_v50 = vld [vmem:[%s869_s2 + $0x8] sm:$0xff]  ;;  %v164_v52 = vld [vmem:[%s869_s2] sm:$0xff]  ;;  %vm502_vm9 = vcmp.lt.s32.totalorder %v498_v62, 14 }
   0x9   :  { %636 = vmatpush3.msra.mxu0 %v59_v7  ;;  %654 = vmatpush3.msra.mxu1 %v575_v25 }
   0xa   :  { %637 = vmatprep.subr.mxu0 %v58_v8  ;;  %655 = vmatprep.subr.mxu1 %v574_v27 }
   0xb   :  { %638 = vmatpush3.msra.mxu0 %v58_v8  ;;  %656 = vmatpush3.msra.mxu1 %v574_v27  ;;  %v500_v8 = vand.u32 15, %v496_v1 }
   0xc   :  { %639 = vmatprep.subr.mxu0 %v57_v9  ;;  %657 = vmatprep.subr.mxu1 %v573_v29 }
   0xd   :  { %640 = vmatpush3.msra.mxu0 %v57_v9  ;;  %658 = vmatpush3.msra.mxu1 %v573_v29  ;;  %vm504_vm11 = vcmp.lt.s32.totalorder %v500_v8, 14 }
   0xe   :  { %641 = vmatprep.subr.mxu0 %v56_v10  ;;  %665 = vmatprep.subr.mxu1 %v167_v31 }
   0xf   :  { %642 = vmatpush3.msra.mxu0 %v56_v10 }
  0x10   :  { %643 = vmatprep.subr.mxu0 %v55_v11 }
  0x11   :  { %644 = vmatpush3.msra.mxu0 %v55_v11 }
  0x12   :  { %679 = vmatprep.subr.mxu0 %v781_v24 }
  0x7d   :  { %v39_v14 = vpop.permute.xlu1 %38  ;;  %v33_v15 = vpop.permute.xlu0 %32 }
  0x7e   :  { %vm43_vm2 = vcmp.eq.s32.totalorder %v33_v15, %v30_v13  ;;  %vm45_vm3 = vcmp.eq.s32.totalorder %v39_v14, %v30_v13 }
  0x7f   :  { %v564_v17 = vsel %vm43_vm2, 1.0, %v706_v16  ;;  %v566_v20 = vsel %vm45_vm3, 1.0, %v706_v16 }
  0x80   :  { %645 = vmatprep.mubr.msk.f32.mxu0 %vm62_vm1, %v564_v17 }
  0x81   :  { %v42_v18 = vpop.permute.xlu1 %41  ;;  %v36_v19 = vpop.permute.xlu0 %35 }
  0x82   :  { %vm44_vm4 = vcmp.eq.s32.totalorder %v36_v19, %v30_v13  ;;  %vm46_vm5 = vcmp.eq.s32.totalorder %v42_v18, %v30_v13 }
  0x83   :  { %v565_v21 = vsel %vm44_vm4, 1.0, %v706_v16  ;;  %v567_v22 = vsel %vm46_vm5, 1.0, %v706_v16 }
  0x84   :  { %646 = vmatmul.mubr.msk.f32.vlgmr.msra.gmra.mxu0 %vm62_vm1, %v565_v21 }
  0x85   :  { %648 = vmatprep.mubr.msk.f32.mxu0 %vm62_vm1, %v566_v20  ;;  %680 = vmatpush3.msra.mxu0 %v781_v24 }
  0x86   :  { %681 = vmatprep.subr.mxu0 %v587_v26 }
  0x87   :  { %682 = vmatpush3.msra.mxu0 %v587_v26 }
  0x88   :  { %649 = vmatmul.mubr.msk.f32.gmra.mxu0 %vm62_vm1, %v567_v22  ;;  %683 = vmatprep.subr.mxu0 %v586_v28 }
  0x89   :  { %684 = vmatpush3.msra.mxu0 %v586_v28 }
  0x8a   :  { %685 = vmatprep.subr.mxu0 %v585_v30 }
  0x8b   :  { %686 = vmatpush3.msra.mxu0 %v585_v30 }
 0x144   :  { %v647_v33 = vpop.f32.mrf.mxu0 }
 0x145   :  { %v169_v35 = vrot.slane %v647_v33, 1  ;;  %v380_v36 = vrot.slane %v647_v33, 2 }
 0x146   :  { %v145_v34 = vpop.f32.mrf.mxu0 }
 0x147   :  { %v168_v37 = vrot.slane %v145_v34, 1  ;;  %v379_v38 = vrot.slane %v145_v34, 2 }
 0x148   :  { %v650_v39 = vpop.f32.mrf.mxu0 }
 0x149   :  { %v177_v40 = vsel %vm174_vm6, %v168_v37, %v169_v35  ;;  %v386_v41 = vsel %vm383_vm8, %v379_v38, %v380_v36  ;;  %v171_v43 = vrot.slane %v650_v39, 1  ;;  %v382_v53 = vrot.slane %v650_v39, 2 }
 0x14a   :  { %v155_v42 = vpop.f32.mrf.mxu0  ;;  %659 = vmatprep.mubr.msk.f32.mxu1 %vm184_vm7, %v177_v40  ;;  %687 = vmatprep.mubr.msk.f32.mxu0 %vm184_vm7, %v386_v41 }
 0x14b   :  { %v170_v44 = vrot.slane %v155_v42, 1  ;;  %v381_v45 = vrot.slane %v155_v42, 2  ;;  %v178_v51 = vsel %vm174_vm6, %v171_v43, %v168_v37  ;;  %v387_v55 = vsel %vm383_vm8, %v382_v53, %v379_v38  ;;  %v593_v37 = vld [vmem:[%s871_s3] ss:$0 sm:$0xff] }
 0x14d   :  { %v176_v46 = vsel %vm174_vm6, %v169_v35, %v170_v44  ;;  %v385_v47 = vsel %vm383_vm8, %v380_v36, %v381_v45  ;;  %v175_v48 = vsel %vm174_vm6, %v170_v44, %v171_v43  ;;  %v384_v54 = vsel %vm383_vm8, %v381_v45, %v382_v53  ;;  %v595_v43 = vld [vmem:[#allocation2] ss:$0 sm:$0xff] }
 0x14e   :  { %660 = vmatmul.mubr.msk.f32.vlgmr.msra.gmra.mxu1 %vm184_vm7, %v176_v46  ;;  %688 = vmatmul.mubr.msk.f32.vlgmr.msra.gmra.mxu0 %vm184_vm7, %v385_v47 }
 0x14f   :  { %666 = vmatpush3.msra.mxu1 %v167_v31  ;;  %662 = vmatprep.mubr.msk.f32.mxu1 %vm184_vm7, %v175_v48 }
 0x150   :  { %667 = vmatprep.subr.mxu1 %v166_v49 }
 0x151   :  { %668 = vmatpush3.msra.mxu1 %v166_v49 }
 0x152   :  { %669 = vmatprep.subr.mxu1 %v165_v50  ;;  %663 = vmatmul.mubr.msk.f32.gmra.mxu1 %vm184_vm7, %v178_v51 }
 0x153   :  { %670 = vmatpush3.msra.mxu1 %v165_v50  ;;  %673 = vmatprep.mubr.msk.f32.mxu1 %vm184_vm7, %v145_v34 }
 0x154   :  { %671 = vmatprep.subr.mxu1 %v164_v52 }
 0x155   :  { %672 = vmatpush3.msra.mxu1 %v164_v52 }
 0x156   :  { %693 = vmatprep.subr.mxu1 %v781_v24  ;;  %674 = vmatmul.mubr.msk.f32.vlgmr.msra.gmra.mxu1 %vm184_vm7, %v647_v33 }
 0x157   :  { %697 = vmatpush3.msra.mxu1 %v781_v24  ;;  %676 = vmatprep.mubr.msk.f32.mxu1 %vm184_vm7, %v155_v42 }
 0x158   :  { %694 = vmatprep.subr.mxu1 %v587_v26 }
 0x159   :  { %698 = vmatpush3.msra.mxu1 %v587_v26 }
 0x15a   :  { %695 = vmatprep.subr.mxu1 %v586_v28  ;;  %677 = vmatmul.mubr.msk.f32.gmra.mxu1 %vm184_vm7, %v650_v39  ;;  %v594_v39 = vld [vmem:[%s872_s4] ss:$0 sm:$0xff] }
 0x15b   :  { %699 = vmatpush3.msra.mxu1 %v586_v28  ;;  %690 = vmatprep.mubr.msk.f32.mxu1 %vm184_vm7, %v384_v54 }
 0x15c   :  { %696 = vmatprep.subr.mxu1 %v585_v30 }
 0x15d   :  { %700 = vmatpush3.msra.mxu1 %v585_v30 }
 0x15e   :  { %691 = vmatmul.mubr.msk.f32.vlgmr.msra.gmra.mxu1 %vm184_vm7, %v387_v55 }
 0x20e   :  { %v661_v57 = vpop.f32.mrf.mxu1  ;;  %v689_v63 = vpop.f32.mrf.mxu0 }
 0x210   :  { %v263_v58 = vpop.f32.mrf.mxu1  ;;  %v471_v6 = vpop.f32.mrf.mxu0 }
 0x212   :  { %v664_v60 = vpop.f32.mrf.mxu1 }
 0x214   :  { %v273_v61 = vpop.f32.mrf.mxu1 }
 0x216   :  { %v675_v0 = vpop.f32.mrf.mxu1 }
 0x217   :  { %v366_v2 = vadd.f32 %v675_v0, %v661_v57 }
 0x218   :  { %v360_v3 = vpop.f32.mrf.mxu1 }
 0x219   :  { %v491_v4 = vadd.f32 %v689_v63, %v366_v2  ;;  %v361_v5 = vadd.f32 %v360_v3, %v263_v58 }
 0x21a   :  { %v678_v7 = vpop.f32.mrf.mxu1 }
 0x21b   :  { %v506_v9 = vsel %vm502_vm9, %v491_v4, -inf  ;;  %v490_v10 = vadd.f32 %v471_v6, %v361_v5  ;;  %v376_v14 = vadd.f32 %v678_v7, %v664_v60 }
 0x21c   :  { %v511_v11 = vsel %vm509_vm10, %v506_v9, -inf  ;;  %v370_v12 = vpop.f32.mrf.mxu1 }
 0x21d   :  { %v510_v13 = vsel %vm509_vm10, %v490_v10, -inf  ;;  %v371_v17 = vadd.f32 %v370_v12, %v273_v61 }
 0x21e   :  { %v512_v15 = vmax.f32 %v510_v13, %v511_v11  ;;  %v692_v16 = vpop.f32.mrf.mxu1 }
 0x21f   :  { %v493_v18 = vadd.f32 %v692_v16, %v376_v14 }
 0x220   :  { %v513_v19 = vrot.slane %v512_v15, 4  ;;  %v481_v20 = vpop.f32.mrf.mxu1 }
 0x221   :  { %v508_v21 = vsel %vm504_vm11, %v493_v18, -inf  ;;  %v492_v22 = vadd.f32 %v481_v20, %v371_v17 }
 0x222   :  { %v514_v23 = vmax.f32 %v512_v15, %v513_v19  ;;  %v520_v24 = vsel %vm509_vm10, %v508_v21, -inf }
 0x223   :  { %v519_v25 = vsel %vm509_vm10, %v492_v22, -inf }
 0x224   :  { %v515_v26 = vrot.slane %v514_v23, 2  ;;  %v521_v27 = vmax.f32 %v519_v25, %v520_v24 }
 0x226   :  { %v522_v28 = vrot.slane %v521_v27, 4  ;;  %v516_v29 = vmax.f32 %v514_v23, %v515_v26 }
 0x228   :  { %v523_v30 = vmax.f32 %v521_v27, %v522_v28  ;;  %v517_v32 = vrot.slane %v516_v29, 1 }
 0x22a   :  { %v524_v31 = vrot.slane %v523_v30, 2  ;;  %v518_v36 = vmax.f32 %v516_v29, %v517_v32 }
 0x22c   :  { %v525_v33 = vmax.f32 %v523_v30, %v524_v31 }
 0x22e   :  { %v526_v34 = vrot.slane %v525_v33, 1 }
 0x230   :  { %v527_v35 = vmax.f32 %v525_v33, %v526_v34 }
 0x232   :  { %v529_v38 = vsel %vm528_vm12, %v518_v36, %v527_v35 }
 0x233   :  { %v537_v40 = vadd.f32 %v593_v37, %v529_v38 }
 0x235   :  { %v545_v41 = vmul.f32 %v594_v39, %v537_v40 }
 0x237   :  { %v547_v42 = vsel %vm546_vm13, %v545_v41, 0.0 }
 0x238   :  { %548 = vadd.xlane.f32.xlu0 %v547_v42 }
 0x2c1   :  { %v549_v44 = vpop.xlane.xlu0 %548 }
 0x2c2   :  { %v557_v45 = vadd.f32 %v595_v43, %v549_v44 }
 0x2c4   :  { %559 = vst.msk [vmem:[%s873_s6] sm:$0x3] %vm558_vm14, %v557_v45 }

</bundles_post_ra>
